<compile_context>
chip_gen: v6e
topology: v6e:2x2x1
jax: 0.10.0
libtpu: 0.0.40
codegen_flags: <defaults>
</compile_context>

<pallas_src>
import jax
import jax.numpy as jnp
from jax.experimental import pallas as pl
from jax.experimental.pallas import tpu as pltpu

LANE = 128      # TPU lane width: feature/head padding target
SUBLANE = 8     # minimum sublane granularity (f32)
ROW_ALIGN = 32  # batch-tile row alignment valid for f32/bf16/int8 tiles


def _round_up(n, m):
    return (n + m - 1) // m * m


def _cdiv(a, b):
    return (a + b - 1) // b


def cybsec_mlp_kernel(x_ref, w1_ref, b1_ref, w2_ref, b2_ref, w3_ref, b3_ref, o_ref):
    # The (x + 1) / 2 preprocessing is already folded into w1/b1 at build time.
    # x arrives in the caller's dtype and is cast to bf16 here (MXU-native),
    # avoiding a separate wrapper-side cast pass over HBM.
    x = x_ref[...].astype(jnp.bfloat16)                                  # (TB, IN)

    # Layer 1: Linear + ReLU (bf16 operands, f32 accumulate + epilogue)
    h = jnp.dot(x, w1_ref[...], preferred_element_type=jnp.float32) + b1_ref[...]
    h = jnp.maximum(h, 0.0)

    # Layer 2: Linear + ReLU
    h = jnp.dot(h.astype(jnp.bfloat16), w2_ref[...],
                preferred_element_type=jnp.float32) + b2_ref[...]
    h = jnp.maximum(h, 0.0)

    # Output head (padded to 128 lanes -> full unmasked vector stores)
    out = jnp.dot(h.astype(jnp.bfloat16), w3_ref[...],
                  preferred_element_type=jnp.float32) + b3_ref[...]

    # QuantIdentity(quant_type='binary', min_val=-1, max_val=1): sign, sign(0) -> +1.
    # +-1 is exact in bf16, so the narrow output dtype costs nothing numerically.
    o_ref[...] = jnp.where(out >= 0.0, 1.0, -1.0).astype(o_ref.dtype)
    # TODO(synk): an in-kernel repack of the single logit column into a
    # (tb//128, 128) lane-dense tile would cut output HBM traffic another ~128x;
    # kept the padded-head store since that relayout is not guaranteed to lower
    # cleanly on all generations.


def prepare_params(params):
    """Fold (x+1)/2 into layer 1, zero-pad hidden/head to 128 lanes, cast to bf16."""
    w1, b1, w2, b2, w3, b3 = params
    in_features, hidden = w1.shape
    out_features = w3.shape[1]

    # (x+1)/2 @ W1 + b1  ==  x @ (0.5*W1) + (b1 + 0.5*sum(W1, axis=0))
    w1f = 0.5 * w1
    b1f = b1 + 0.5 * jnp.sum(w1, axis=0, keepdims=True)

    hid_pad = _round_up(hidden, LANE)
    out_pad = _round_up(max(out_features, 1), LANE)

    # Zero padding is exact: padded hidden units get pre-activation 0 -> ReLU 0,
    # and their (zero) outgoing weights contribute nothing downstream.
    w1p = jnp.zeros((in_features, hid_pad), jnp.float32).at[:, :hidden].set(w1f)
    b1p = jnp.zeros((1, hid_pad), jnp.float32).at[:, :hidden].set(b1f)
    w2p = jnp.zeros((hid_pad, hid_pad), jnp.float32).at[:hidden, :hidden].set(w2)
    b2p = jnp.zeros((1, hid_pad), jnp.float32).at[:, :hidden].set(b2)
    w3p = jnp.zeros((hid_pad, out_pad), jnp.float32).at[:hidden, :out_features].set(w3)
    b3p = jnp.zeros((1, out_pad), jnp.float32).at[:, :out_features].set(b3)

    prepared = (
        w1p.astype(jnp.bfloat16), b1p,   # biases stay f32 (added to f32 accumulators)
        w2p.astype(jnp.bfloat16), b2p,
        w3p.astype(jnp.bfloat16), b3p,
    )
    # TODO(synk): on v5e/v6e the quantized weights (and the +-1 inputs) could ship
    # as int8 and use the integer MXU; kept bf16 so the same kernel is valid on v7x.
    return prepared, out_features


def cybsec_mlp_forward(x, prepared, out_features, *, block_batch=4096):
    w1, b1, w2, b2, w3, b3 = prepared
    batch, in_features = x.shape
    hid_pad = w1.shape[1]
    out_pad = w3.shape[1]
    assert w1.shape[0] == in_features

    # Sanitize the user-supplied tile cap (multiple of 32 covers f32/bf16/int8).
    block_batch = max(ROW_ALIGN, (block_batch // ROW_ALIGN) * ROW_ALIGN)

    rb = _round_up(batch, SUBLANE)
    # Number of grid steps: enough to respect block_batch, at least 2 when the
    # batch allows it so v7x's two TensorCores can both get work, and the tile
    # size re-derived from the step count to keep batch-padding waste small.
    n_steps = max(_cdiv(rb, block_batch), 1)
    if n_steps == 1 and rb >= 2 * ROW_ALIGN:
        n_steps = 2
    if n_steps == 1:
        tb = rb  # single full-extent block: no (8,128) divisibility constraint
    else:
        tb = _round_up(_cdiv(rb, n_steps), ROW_ALIGN)
        n_steps = _cdiv(rb, tb)
    padded_batch = n_steps * tb

    if padded_batch != batch:
        x = jnp.pad(x, ((0, padded_batch - batch), (0, 0)))

    flops = 2 * padded_batch * (in_features * hid_pad
                                + hid_pad * hid_pad
                                + hid_pad * out_pad)
    bytes_accessed = (padded_batch * in_features * x.dtype.itemsize
                      + padded_batch * out_pad * 2  # bf16 output
                      + sum(int(a.size) * a.dtype.itemsize
                            for a in (w1, b1, w2, b2, w3, b3)))

    out = pl.pallas_call(
        cybsec_mlp_kernel,
        out_shape=jax.ShapeDtypeStruct((padded_batch, out_pad), jnp.bfloat16),
        grid=(n_steps,),
        in_specs=[
            pl.BlockSpec((tb, in_features), lambda i: (i, 0)),      # x: tiled over batch
            pl.BlockSpec((in_features, hid_pad), lambda i: (0, 0)),  # weights/biases:
            pl.BlockSpec((1, hid_pad), lambda i: (0, 0)),            #   full-array blocks,
            pl.BlockSpec((hid_pad, hid_pad), lambda i: (0, 0)),      #   VMEM-resident across
            pl.BlockSpec((1, hid_pad), lambda i: (0, 0)),            #   all grid steps
            pl.BlockSpec((hid_pad, out_pad), lambda i: (0, 0)),
            pl.BlockSpec((1, out_pad), lambda i: (0, 0)),
        ],
        out_specs=pl.BlockSpec((tb, out_pad), lambda i: (i, 0)),     # lane-dense bf16 tile
        compiler_params=pltpu.CompilerParams(
            # Batch axis is independent: megacore sharding on v7x, no-op on v5e/v6e.
            dimension_semantics=("parallel",),
            # Large tiles also fit v5e's smaller default scope; well under v7x's
            # 64 MiB physical VMEM.
            vmem_limit_bytes=32 * 1024 * 1024,
        ),
        cost_estimate=pl.CostEstimate(
            flops=int(flops), transcendentals=0, bytes_accessed=int(bytes_accessed)),
    )(x, w1, b1, w2, b2, w3, b3)

    # Drop batch padding and the lane padding of the 1-wide binary head; the
    # final cast touches only (batch, out_features) elements.
    return out[:batch, :out_features].astype(jnp.float32)


def init_params(key, in_features, hidden, out_features):
    k1, k2, k3 = jax.random.split(key, 3)
    # Deterministic synthetic weights (stand-in for the pretrained checkpoint).
    w1 = (jax.random.normal(k1, (in_features, hidden), jnp.float32)
          * (1.0 / jnp.sqrt(in_features)))
    b1 = jnp.zeros((1, hidden), jnp.float32)
    w2 = (jax.random.normal(k2, (hidden, hidden), jnp.float32)
          * (1.0 / jnp.sqrt(hidden)))
    b2 = jnp.zeros((1, hidden), jnp.float32)
    w3 = (jax.random.normal(k3, (hidden, out_features), jnp.float32)
          * (1.0 / jnp.sqrt(hidden)))
    b3 = jnp.zeros((1, out_features), jnp.float32)
    return (w1, b1, w2, b2, w3, b3)


def ref_forward(x, params):
    """Pure-JAX f32 reference of the original PyTorch forward."""
    w1, b1, w2, b2, w3, b3 = params
    h = (x + 1.0) * 0.5
    h = jnp.maximum(h @ w1 + b1, 0.0)
    h = jnp.maximum(h @ w2 + b2, 0.0)
    logits = h @ w3 + b3
    return jnp.where(logits >= 0.0, 1.0, -1.0), logits


def _check(x, params, prepared, n_out):
    out = jax.block_until_ready(cybsec_mlp_forward(x, prepared, n_out))
    batch = x.shape[0]
    assert out.shape == (batch, n_out)
    assert bool(jnp.all(jnp.abs(out) == 1.0))
    # Compare against the f32 reference, ignoring near-threshold ties
    # (bf16 matmul operands can flip the sign only when |logit| is ~0).
    ref_out, logits = ref_forward(x, params)
    safe = jnp.abs(logits) > 1e-2
    assert bool(jnp.all(jnp.where(safe, out == ref_out, True)))


if __name__ == "__main__":
    key = jax.random.PRNGKey(0)
    k_x, k_x2, k_p = jax.random.split(key, 3)

    in_features = 64
    hidden = 64
    out_features = 1  # binary classification head, as in the cybersecurity MLP

    params = init_params(k_p, in_features, hidden, out_features)
    prepared, n_out = prepare_params(params)

    # Inputs in {-1, +1}, as fed to the exported CybSec MLP.
    x_small = jnp.where(
        jax.random.bernoulli(k_x, 0.5, (8, in_features)), 1.0, -1.0
    ).astype(jnp.float32)
    _check(x_small, params, prepared, n_out)       # single-tile path

    x_ragged = jnp.where(
        jax.random.bernoulli(k_x2, 0.5, (72, in_features)), 1.0, -1.0
    ).astype(jnp.float32)
    _check(x_ragged, params, prepared, n_out)      # multi-tile + batch-padded path

    print("KERNEL_OK")
</pallas_src>

<mosaic_0001>
module attributes {stable_mosaic.version = 11 : i64} {
  func.func @cybsec_mlp_kernel(%arg0: i32, %arg1: memref<8x64xf32, #tpu.memory_space<vmem>>, %arg2: memref<64x128xbf16, #tpu.memory_space<vmem>>, %arg3: memref<1x128xf32, #tpu.memory_space<vmem>>, %arg4: memref<128x128xbf16, #tpu.memory_space<vmem>>, %arg5: memref<1x128xf32, #tpu.memory_space<vmem>>, %arg6: memref<128x128xbf16, #tpu.memory_space<vmem>>, %arg7: memref<1x128xf32, #tpu.memory_space<vmem>>, %arg8: memref<8x128xbf16, #tpu.memory_space<vmem>>) attributes {dimension_semantics = [#tpu.dimension_semantics<parallel>], iteration_bounds = array<i64: 1>, scalar_prefetch = 0 : i64, scratch_operands = 0 : i64, tpu.core_type = #tpu.core_type<tc>, window_params = [{transform_indices = @transform_0, window_bounds = array<i64: 8, 64>}, {pipeline_mode = #tpu.pipeline_mode<synchronous>, transform_indices = @transform_1, window_bounds = array<i64: 64, 128>}, {pipeline_mode = #tpu.pipeline_mode<synchronous>, transform_indices = @transform_2, window_bounds = array<i64: 1, 128>}, {pipeline_mode = #tpu.pipeline_mode<synchronous>, transform_indices = @transform_3, window_bounds = array<i64: 128, 128>}, {pipeline_mode = #tpu.pipeline_mode<synchronous>, transform_indices = @transform_4, window_bounds = array<i64: 1, 128>}, {pipeline_mode = #tpu.pipeline_mode<synchronous>, transform_indices = @transform_5, window_bounds = array<i64: 128, 128>}, {pipeline_mode = #tpu.pipeline_mode<synchronous>, transform_indices = @transform_6, window_bounds = array<i64: 1, 128>}, {transform_indices = @transform_7, window_bounds = array<i64: 8, 128>}]} {
    %c0 = arith.constant 0 : index
    %c0_0 = arith.constant 0 : index
    %0 = vector.load %arg1[%c0, %c0_0] : memref<8x64xf32, #tpu.memory_space<vmem>>, vector<8x64xf32>
    %1 = arith.truncf %0 : vector<8x64xf32> to vector<8x64xbf16>
    %c0_1 = arith.constant 0 : index
    %c0_2 = arith.constant 0 : index
    %2 = vector.load %arg2[%c0_1, %c0_2] : memref<64x128xbf16, #tpu.memory_space<vmem>>, vector<64x128xbf16>
    %cst = arith.constant dense<0.000000e+00> : vector<8x128xf32>
    %3 = tpu.matmul %1, %2, %cst {dimension_numbers = #tpu.dot_dimension_numbers<[1], [0], [0], [1], [0, 0, 1, 1], [], []>} : vector<8x64xbf16>, vector<64x128xbf16>, vector<8x128xf32> -> vector<8x128xf32>
    %c0_3 = arith.constant 0 : index
    %c0_4 = arith.constant 0 : index
    %4 = vector.load %arg3[%c0_3, %c0_4] : memref<1x128xf32, #tpu.memory_space<vmem>>, vector<1x128xf32>
    %5 = vector.broadcast %4 : vector<1x128xf32> to vector<8x128xf32>
    %6 = arith.addf %3, %5 : vector<8x128xf32>
    %cst_5 = arith.constant 0.000000e+00 : f32
    %7 = vector.broadcast %cst_5 : f32 to vector<8x128xf32>
    %8 = arith.maximumf %6, %7 : vector<8x128xf32>
    %9 = arith.truncf %8 : vector<8x128xf32> to vector<8x128xbf16>
    %c0_6 = arith.constant 0 : index
    %c0_7 = arith.constant 0 : index
    %10 = vector.load %arg4[%c0_6, %c0_7] : memref<128x128xbf16, #tpu.memory_space<vmem>>, vector<128x128xbf16>
    %cst_8 = arith.constant dense<0.000000e+00> : vector<8x128xf32>
    %11 = tpu.matmul %9, %10, %cst_8 {dimension_numbers = #tpu.dot_dimension_numbers<[1], [0], [0], [1], [0, 0, 1, 1], [], []>} : vector<8x128xbf16>, vector<128x128xbf16>, vector<8x128xf32> -> vector<8x128xf32>
    %c0_9 = arith.constant 0 : index
    %c0_10 = arith.constant 0 : index
    %12 = vector.load %arg5[%c0_9, %c0_10] : memref<1x128xf32, #tpu.memory_space<vmem>>, vector<1x128xf32>
    %13 = vector.broadcast %12 : vector<1x128xf32> to vector<8x128xf32>
    %14 = arith.addf %11, %13 : vector<8x128xf32>
    %cst_11 = arith.constant 0.000000e+00 : f32
    %15 = vector.broadcast %cst_11 : f32 to vector<8x128xf32>
    %16 = arith.maximumf %14, %15 : vector<8x128xf32>
    %17 = arith.truncf %16 : vector<8x128xf32> to vector<8x128xbf16>
    %c0_12 = arith.constant 0 : index
    %c0_13 = arith.constant 0 : index
    %18 = vector.load %arg6[%c0_12, %c0_13] : memref<128x128xbf16, #tpu.memory_space<vmem>>, vector<128x128xbf16>
    %cst_14 = arith.constant dense<0.000000e+00> : vector<8x128xf32>
    %19 = tpu.matmul %17, %18, %cst_14 {dimension_numbers = #tpu.dot_dimension_numbers<[1], [0], [0], [1], [0, 0, 1, 1], [], []>} : vector<8x128xbf16>, vector<128x128xbf16>, vector<8x128xf32> -> vector<8x128xf32>
    %c0_15 = arith.constant 0 : index
    %c0_16 = arith.constant 0 : index
    %20 = vector.load %arg7[%c0_15, %c0_16] : memref<1x128xf32, #tpu.memory_space<vmem>>, vector<1x128xf32>
    %21 = vector.broadcast %20 : vector<1x128xf32> to vector<8x128xf32>
    %22 = arith.addf %19, %21 : vector<8x128xf32>
    %cst_17 = arith.constant 0.000000e+00 : f32
    %23 = vector.broadcast %cst_17 : f32 to vector<8x128xf32>
    %24 = arith.cmpf oge, %22, %23 : vector<8x128xf32>
    %cst_18 = arith.constant 1.000000e+00 : f32
    %cst_19 = arith.constant -1.000000e+00 : f32
    %25 = vector.broadcast %cst_18 : f32 to vector<8x128xf32>
    %26 = vector.broadcast %cst_19 : f32 to vector<8x128xf32>
    %27 = arith.select %24, %25, %26 : vector<8x128xi1>, vector<8x128xf32>
    %28 = arith.truncf %27 : vector<8x128xf32> to vector<8x128xbf16>
    %c0_20 = arith.constant 0 : index
    %c0_21 = arith.constant 0 : index
    %29 = vector.load %arg8[%c0_20, %c0_21] : memref<8x128xbf16, #tpu.memory_space<vmem>>, vector<8x128xbf16>
    tpu.vector_store %arg8[%c0_20, %c0_21], %28 {strides = array<i32>} : memref<8x128xbf16, #tpu.memory_space<vmem>>, vector<8x128xbf16>,
    return
  }
  func.func @transform_0(%arg0: i32) -> (i32, i32) {
    %c0_i32 = arith.constant 0 : i32
    %c0_i32_0 = arith.constant 0 : i32
    return %arg0, %c0_i32 : i32, i32
  }
  func.func @transform_1(%arg0: i32) -> (i32, i32) {
    %c0_i32 = arith.constant 0 : i32
    %c0_i32_0 = arith.constant 0 : i32
    %c0_i32_1 = arith.constant 0 : i32
    return %c0_i32, %c0_i32_0 : i32, i32
  }
  func.func @transform_2(%arg0: i32) -> (i32, i32) {
    %c0_i32 = arith.constant 0 : i32
    %c0_i32_0 = arith.constant 0 : i32
    %c0_i32_1 = arith.constant 0 : i32
    return %c0_i32, %c0_i32_0 : i32, i32
  }
  func.func @transform_3(%arg0: i32) -> (i32, i32) {
    %c0_i32 = arith.constant 0 : i32
    %c0_i32_0 = arith.constant 0 : i32
    %c0_i32_1 = arith.constant 0 : i32
    return %c0_i32, %c0_i32_0 : i32, i32
  }
  func.func @transform_4(%arg0: i32) -> (i32, i32) {
    %c0_i32 = arith.constant 0 : i32
    %c0_i32_0 = arith.constant 0 : i32
    %c0_i32_1 = arith.constant 0 : i32
    return %c0_i32, %c0_i32_0 : i32, i32
  }
  func.func @transform_5(%arg0: i32) -> (i32, i32) {
    %c0_i32 = arith.constant 0 : i32
    %c0_i32_0 = arith.constant 0 : i32
    %c0_i32_1 = arith.constant 0 : i32
    return %c0_i32, %c0_i32_0 : i32, i32
  }
  func.func @transform_6(%arg0: i32) -> (i32, i32) {
    %c0_i32 = arith.constant 0 : i32
    %c0_i32_0 = arith.constant 0 : i32
    %c0_i32_1 = arith.constant 0 : i32
    return %c0_i32, %c0_i32_0 : i32, i32
  }
  func.func @transform_7(%arg0: i32) -> (i32, i32) {
    %c0_i32 = arith.constant 0 : i32
    %c0_i32_0 = arith.constant 0 : i32
    return %arg0, %c0_i32 : i32, i32
  }
}

</mosaic_0001>

<bundles_post_ra>
// kernel: tpu_custom_call.1
= control target key start
LH: loop header
LB: loop body
LE: loop exit
PB: predicated region body
PF: predicated region fallthrough
CT: control target
= control target key end

     0   :  { %12 = vsyncpa [#allocation3], 0  ;;  %s759_s0 = inlined_call_operand.hbm [shape: f32[8,64], index: 0, kind: input, shape index: {}]   ;;  %s760_s1 = inlined_call_operand.hbm [shape: bf16[64,128], index: 1, kind: input, shape index: {}]   ;;  %s761_s2 = inlined_call_operand.vmem [shape: f32[1,128], index: 2, kind: input, shape index: {}]   ;;  %s762_s3 = inlined_call_operand.hbm [shape: bf16[128,128], index: 3, kind: input, shape index: {}]   ;;  %s763_s4 = inlined_call_operand.vmem [shape: f32[1,128], index: 4, kind: input, shape index: {}]   ;;  %s764_s5 = inlined_call_operand.hbm [shape: bf16[128,128], index: 5, kind: input, shape index: {}]   ;;  %s765_s6 = inlined_call_operand.vmem [shape: f32[1,128], index: 6, kind: input, shape index: {}]   ;;  %s766_s7 = inlined_call_operand.hbm [shape: bf16[8,128], index: 7, kind: output, shape index: {}]  }
   0x1   :  { %13 = vsyncpa [#allocation6], 0 }
   0x2   :  { %14 = vsyncpa [#allocation9], 0 }
   0x3   :  { %15 = vsyncpa [#allocation4], 0  ;;  %s650_s24 = smov [#allocation5]  }
   0x4   :  { %s31_s25 = sshll.u32 %s650_s24, 4  ;;  %s32_s25 = int_to_ptr.vmem [resolvable:$true] %s31_s25 }
   0x5   :  { %s550_s26 = scalar_lea.vmem %s32_s25, 512  ;;  %p555_p1 = scmp.lt.s32.totalorder %s32_s25, %s32_s25 }
   0x6   :  { %p551_p0 = scmp.ne.s32.totalorder %s32_s25, %s550_s26  ;;  %p556_p2 = scmp.lt.s32.totalorder %s550_s26, %s550_s26 }
   0x8   :  { %p557_p3 = por %p556_p2, %p555_p1 }
   0xa   :  { %p558_p4 = pnand %p557_p3, %p551_p0 }
   0xc   :  { %561 = shalt.err (!%p558_p4)
}
   0xd   :  { %s651_s27 = smov 64   ;;  %s652_s28 = smov 4  }
   0xe   :  { %37 = dma.hbm_to_vmem [thread:$0]  %s760_s1, 512, %s32_s25, [#allocation6], %s651_s27, %s651_s27, %s652_s28  }
   0xf   :  { %s653_s8 = smov [#allocation2]   ;;  %s654_s10 = smov [#allocation7]  }
  0x10   :  { %s22_s9 = sshll.u32 %s653_s8, 4  ;;  %s45_s11 = sshll.u32 %s654_s10, 4  ;;  %s23_s9 = int_to_ptr.vmem [resolvable:$true] %s22_s9  ;;  %s46_s11 = int_to_ptr.vmem [resolvable:$true] %s45_s11 }
  0x11   :  { %s570_s12 = scalar_lea.vmem %s23_s9, 128  ;;  %p575_p6 = scmp.lt.s32.totalorder %s23_s9, %s23_s9 }
  0x12   :  { %p571_p5 = scmp.ne.s32.totalorder %s23_s9, %s570_s12  ;;  %p576_p7 = scmp.lt.s32.totalorder %s570_s12, %s570_s12 }
  0x14   :  { %p577_p8 = por %p576_p7, %p575_p6 }
  0x16   :  { %p578_p9 = pnand %p577_p8, %p571_p5 }
  0x18   :  { %581 = shalt.err (!%p578_p9)
}
  0x19   :  { %25 = dma.hbm_to_vmem [thread:$0]  %s759_s0, 128, %s23_s9, [#allocation3]  }
  0x1a   :  { %s590_s15 = scalar_lea.vmem %s46_s11, 1024  ;;  %p595_p11 = scmp.lt.s32.totalorder %s46_s11, %s46_s11 }
  0x1b   :  { %p591_p10 = scmp.ne.s32.totalorder %s46_s11, %s590_s15  ;;  %p596_p12 = scmp.lt.s32.totalorder %s590_s15, %s590_s15 }
  0x1d   :  { %p597_p13 = por %p596_p12, %p595_p11 }
  0x1f   :  { %p598_p0 = pnand %p597_p13, %p591_p10 }
  0x21   :  { %601 = shalt.err (!%p598_p0)
}
  0x22   :  { %51 = dma.hbm_to_vmem [thread:$0]  %s762_s3, 1024, %s46_s11, [#allocation6], %s651_s27, %s651_s27, %s652_s28  }
  0x23   :  { %s655_s17 = smov [#allocation8]  }
  0x24   :  { %s59_s18 = sshll.u32 %s655_s17, 4  ;;  %s60_s18 = int_to_ptr.vmem [resolvable:$true] %s59_s18 }
  0x25   :  { %s610_s19 = scalar_lea.vmem %s60_s18, 1024  ;;  %p615_p2 = scmp.lt.s32.totalorder %s60_s18, %s60_s18 }
  0x26   :  { %p611_p1 = scmp.ne.s32.totalorder %s60_s18, %s610_s19  ;;  %p616_p3 = scmp.lt.s32.totalorder %s610_s19, %s610_s19 }
  0x28   :  { %p617_p4 = por %p616_p3, %p615_p2 }
  0x2a   :  { %p618_p5 = pnand %p617_p4, %p611_p1 }
  0x2c   :  { %621 = shalt.err (!%p618_p5)
}
  0x2d   :  { %65 = dma.hbm_to_vmem [thread:$0]  %s764_s5, 1024, %s60_s18, [#allocation9], %s651_s27, %s651_s27, %s652_s28  }
  0x2e   :  { %642 = dma.done.wait [#allocation3], 128  }
  0x2f   :  { %643 = vsyncadd [#allocation3], 4294967168 }
  0x30   :  { %644 = dma.done.wait [#allocation6], 1536  }
  0x31   :  { %645 = vsyncadd [#allocation6], 4294965760 }
  0x32   :  { %646 = dma.done.wait [#allocation9], 1024  }
  0x33   :  { %647 = vsyncadd [#allocation9], 4294966272  ;;  %v656_v0 = vmov 0.0   ;;  %vm657_vm0 = vmmov 0   ;;  %v522_v1 = vld [vmem:[#allocation5 + $0x18] sm:$0xff]   ;;  %v523_v2 = vld [vmem:[#allocation5 + $0x10] sm:$0xff]  }
  0x34   :  { %460 = vmatprep.subr.bf16.mxu0 %v656_v0  ;;  %468 = vmatprep.mubr.msk.bf16.mxu0 %vm657_vm0, %v656_v0  ;;  %v526_v3 = vld [vmem:[#allocation7 + $0x38] sm:$0xff]   ;;  %v524_v4 = vld [vmem:[#allocation5 + $0x8] sm:$0xff]   ;;  %v527_v5 = vld [vmem:[#allocation7 + $0x30] sm:$0xff]   ;;  %vm122_vm1 = vcmask 523264   ;;  %s658_s24 = smov [#allocation10]   ;;  %v659_v43 = vmov -1.0  }
  0x35   :  { %472 = vmatprep.subr.bf16.mxu1 %v656_v0  ;;  %488 = vmatprep.mubr.msk.bf16.mxu1 %vm657_vm0, %v656_v0  ;;  %v525_v6 = vld [vmem:[#allocation5] sm:$0xff]   ;;  %v81_v7 = vld [vmem:[#allocation2] sm:$0xff]  ;;  %v528_v8 = vld [vmem:[#allocation7 + $0x28] sm:$0xff]   ;;  %s402_s25 = sshll.u32 %s658_s24, 4  ;;  %s403_s25 = int_to_ptr.vmem [resolvable:$true] %s402_s25 }
  0x36   :  { %461 = vmatpush3.bf16.msra.mxu0 %v522_v1  ;;  %473 = vmatpush3.bf16.msra.mxu1 %v526_v3  ;;  %v82_v9 = vpack.c.bf16 %v81_v7, %v81_v7  ;;  %v529_v10 = vld [vmem:[#allocation7 + $0x20] sm:$0xff]   ;;  %v530_v11 = vld [vmem:[#allocation7 + $0x18] sm:$0xff]   ;;  %v531_v12 = vld [vmem:[#allocation7 + $0x10] sm:$0xff]   ;;  %p627_p7 = scmp.lt.s32.totalorder %s403_s25, %s403_s25 }
  0x37   :  { %462 = vmatprep.subr.bf16.mxu0 %v656_v0  ;;  %474 = vmatprep.subr.bf16.mxu1 %v656_v0  ;;  %v532_v13 = vld [vmem:[#allocation7 + $0x8] sm:$0xff]   ;;  %v533_v14 = vld [vmem:[#allocation7] sm:$0xff]   ;;  %v534_v15 = vld [vmem:[#allocation8 + $0x38] sm:$0xff]  }
  0x38   :  { %v535_v16 = vld [vmem:[#allocation8 + $0x30] sm:$0xff]   ;;  %v536_v17 = vld [vmem:[#allocation8 + $0x28] sm:$0xff]   ;;  %v537_v18 = vld [vmem:[#allocation8 + $0x20] sm:$0xff]  }
  0x39   :  { %v538_v19 = vld [vmem:[#allocation8 + $0x18] sm:$0xff]   ;;  %v539_v20 = vld [vmem:[#allocation8 + $0x10] sm:$0xff]   ;;  %v540_v29 = vld [vmem:[#allocation8 + $0x8] sm:$0xff]  }
  0x3a   :  { %463 = vmatpush3.bf16.msra.mxu0 %v523_v2  ;;  %475 = vmatpush3.bf16.msra.mxu1 %v527_v5  ;;  %v413_v21 = vld [vmem:[%s761_s2] ss:$0 sm:$0xff]  ;;  %v541_v30 = vld [vmem:[#allocation8] sm:$0xff]  }
  0x3b   :  { %464 = vmatprep.subr.bf16.mxu0 %v656_v0  ;;  %476 = vmatprep.subr.bf16.mxu1 %v656_v0  ;;  %v419_v31 = vld [vmem:[%s763_s4] ss:$0 sm:$0xff]  ;;  %s622_s4 = scalar_lea.vmem %s403_s25, 64 }
  0x3c   :  { %v428_v39 = vld [vmem:[%s765_s6] ss:$0 sm:$0xff]  ;;  %p623_p6 = scmp.ne.s32.totalorder %s403_s25, %s622_s4  ;;  %p628_p8 = scmp.lt.s32.totalorder %s622_s4, %s622_s4 }
  0x3e   :  { %465 = vmatpush3.bf16.msra.mxu0 %v524_v4  ;;  %477 = vmatpush3.bf16.msra.mxu1 %v528_v8  ;;  %p629_p9 = por %p628_p8, %p627_p7 }
  0x3f   :  { %466 = vmatprep.subr.bf16.mxu0 %v656_v0  ;;  %478 = vmatprep.subr.bf16.mxu1 %v656_v0 }
  0x40   :  { %p630_p10 = pnand %p629_p9, %p623_p6 }
  0x42   :  { %467 = vmatpush3.bf16.msra.mxu0 %v525_v6  ;;  %479 = vmatpush3.bf16.msra.mxu1 %v529_v10 }
  0x43   :  { %492 = vmatprep.subr.bf16.mxu0 %v656_v0  ;;  %480 = vmatprep.subr.bf16.mxu1 %v656_v0 }
  0x45   :  { %469 = vmatmul.mubr.msk.bf16.vlgmr.msra.gmra.mxu0 %vm122_vm1, %v82_v9 }
  0x46   :  { %508 = vmatprep.mubr.msk.bf16.mxu0 %vm657_vm0, %v656_v0  ;;  %481 = vmatpush3.bf16.msra.mxu1 %v530_v11 }
  0x47   :  { %482 = vmatprep.subr.bf16.mxu1 %v656_v0  ;;  %493 = vmatpush3.bf16.msra.mxu0 %v534_v15 }
  0x48   :  { %494 = vmatprep.subr.bf16.mxu0 %v656_v0 }
  0x4a   :  { %483 = vmatpush3.bf16.msra.mxu1 %v531_v12 }
  0x4b   :  { %484 = vmatprep.subr.bf16.mxu1 %v656_v0  ;;  %495 = vmatpush3.bf16.msra.mxu0 %v535_v16 }
  0x4c   :  { %496 = vmatprep.subr.bf16.mxu0 %v656_v0 }
  0x4e   :  { %485 = vmatpush3.bf16.msra.mxu1 %v532_v13 }
  0x4f   :  { %486 = vmatprep.subr.bf16.mxu1 %v656_v0  ;;  %497 = vmatpush3.bf16.msra.mxu0 %v536_v17 }
  0x50   :  { %498 = vmatprep.subr.bf16.mxu0 %v656_v0 }
  0x52   :  { %487 = vmatpush3.bf16.msra.mxu1 %v533_v14 }
  0x53   :  { %499 = vmatpush3.bf16.msra.mxu0 %v537_v18 }
  0x54   :  { %500 = vmatprep.subr.bf16.mxu0 %v656_v0 }
  0x57   :  { %501 = vmatpush3.bf16.msra.mxu0 %v538_v19 }
  0x58   :  { %502 = vmatprep.subr.bf16.mxu0 %v656_v0 }
  0x5b   :  { %503 = vmatpush3.bf16.msra.mxu0 %v539_v20 }
  0x5c   :  { %504 = vmatprep.subr.bf16.mxu0 %v656_v0 }
  0x5f   :  { %505 = vmatpush3.bf16.msra.mxu0 %v540_v29 }
  0x60   :  { %506 = vmatprep.subr.bf16.mxu0 %v656_v0 }
  0x63   :  { %507 = vmatpush3.bf16.msra.mxu0 %v541_v30 }
 0x105   :  { %v160_v22 = vpop.f32.mrf.mxu0 }
 0x106   :  { %v161_v23 = vadd.f32 %v413_v21, %v160_v22 }
 0x107   :  { %v470_v24 = vpop.f32.mrf.mxu0 }
 0x108   :  { %v166_v25 = vmax.f32 %v161_v23, 0.0 }
 0x109   :  { %v163_v26 = vpop.f32.mrf.mxu0 }
 0x10a   :  { %v167_v27 = vpack.c.bf16 %v166_v25, %v166_v25 }
 0x10b   :  { %v471_v28 = vpop.f32.mrf.mxu0 }
 0x10c   :  { %489 = vmatmul.mubr.bf16.vlgmr.msra.gmra.mxu1 %v167_v27 }
 0x1cc   :  { %v273_v32 = vpop.f32.mrf.mxu1 }
 0x1cd   :  { %v274_v33 = vadd.f32 %v419_v31, %v273_v32 }
 0x1ce   :  { %v490_v34 = vpop.f32.mrf.mxu1 }
 0x1cf   :  { %v279_v35 = vmax.f32 %v274_v33, 0.0 }
 0x1d0   :  { %v276_v36 = vpop.f32.mrf.mxu1 }
 0x1d1   :  { %v280_v37 = vpack.c.bf16 %v279_v35, %v279_v35 }
 0x1d2   :  { %v491_v38 = vpop.f32.mrf.mxu1 }
 0x1d3   :  { %509 = vmatmul.mubr.bf16.vlgmr.msra.gmra.mxu0 %v280_v37 }
 0x293   :  { %v386_v40 = vpop.f32.mrf.mxu0 }
 0x294   :  { %v387_v41 = vadd.f32 %v428_v39, %v386_v40 }
 0x295   :  { %v510_v42 = vpop.f32.mrf.mxu0 }
 0x296   :  { %vm392_vm2 = vcmp.ge.f32.partialorder %v387_v41, 0.0 }
 0x297   :  { %v393_v44 = vsel %vm392_vm2, 1.0, %v659_v43  ;;  %v389_v45 = vpop.f32.mrf.mxu0 }
 0x298   :  { %v394_v46 = vpack.c.bf16 %v393_v44, %v393_v44 }
 0x299   :  { %v511_v47 = vpop.f32.mrf.mxu0 }
 0x29a   :  { %395 = vst [vmem:[#allocation10] sm:$0xf] %v394_v46 }
 0x29b   :  { %633 = shalt.err (!%p630_p10)
}
 0x29c   :  { %405 = dma.vmem_to_hbm [thread:$0]  %s403_s25, 64, %s766_s7, [#allocation4]  }
 0x29d   :  { %648 = dma.done.wait [#allocation4], 64  }
 0x29e   :  { %649 = vsyncadd [#allocation4], 4294967232 }
 0x29f   :  { %409 = vsyncpa [#allocation3], 1 }
 0x2a0   :  { %410 = vsyncpa [#allocation6], 1 }
 0x2a1   :  { %411 = vsyncpa [#allocation9], 1 }
 0x2a2   :  { %412 = vsyncpa [#allocation4], 1 }

</bundles_post_ra>
